<compile_context>
chip_gen: v7x
topology: tpu7x:2x2x1
jax: 0.10.0
libtpu: 0.0.40
codegen_flags: <defaults>
</compile_context>

<pallas_src>
import math

import jax
import jax.numpy as jnp
from jax import lax
from jax.experimental import pallas as pl
from jax.experimental.pallas import tpu as pltpu

_EPS = 1e-12                      # F.normalize default eps
_FEAT_RESIDENT_BYTES = 4 << 20    # keep features fully VMEM-resident below this
_VMEM_BUDGET = 26 << 20           # stay under the 32 MiB default scoped VMEM


def _arc_margin_kernel(f_ref, w_ref, o_ref, wn_ref):
    # f_ref:  (tb, D) f32 un-normalized feature tile
    # w_ref:  (to, D) f32 un-normalized weight tile
    # o_ref:  (tb, to) f32 cosine tile
    # wn_ref: (to, D) bf16 scratch: normalized weight, cached per weight block
    ib = pl.program_id(1)

    # Normalize + cast the weight tile once per weight block.  The weight block
    # index depends only on the outer grid axis; the inner batch axis is
    # "arbitrary" (sequential per core), so ib == 0 always runs first per jo.
    @pl.when(ib == 0)
    def _():
        w = w_ref[...]
        ssq = jnp.sum(w * w, axis=1, keepdims=True)                  # (to, 1)
        w_inv = 1.0 / jnp.maximum(jnp.sqrt(ssq), _EPS)
        wn_ref[...] = (w * w_inv).astype(jnp.bfloat16)

    f = f_ref[...]
    f_ssq = jnp.sum(f * f, axis=1, keepdims=True)                    # (tb, 1)
    f_inv = 1.0 / jnp.maximum(jnp.sqrt(f_ssq), _EPS)

    # Contract D of BOTH operands: no explicit transpose of the (to, D) tile.
    dots = lax.dot_general(
        f.astype(jnp.bfloat16),
        wn_ref[...],
        dimension_numbers=(((1,), (1,)), ((), ())),
        preferred_element_type=jnp.float32,
    )                                                                # (tb, to)
    o_ref[...] = (dots * f_inv).astype(o_ref.dtype)


def _round_up(x, m):
    return ((x + m - 1) // m) * m


def _pick_tile(n, preferred, align):
    """Largest `align`-aligned tile <= min(n, preferred) dividing n.

    `n` must be a multiple of `align`, so the result is always >= align."""
    if n <= preferred:
        return n
    t = (preferred // align) * align
    while t > align:
        if n % t == 0:
            return t
        t -= align
    return align


def _vmem_estimate(tb, to, d):
    return (2 * tb * d * 4      # feature tile, f32, double-buffered
            + 2 * to * d * 4    # weight tile, f32, double-buffered
            + to * d * 2        # normalized-weight bf16 scratch
            + 2 * tb * to * 4)  # output tile, f32, double-buffered


def arc_margin_product(features, weight, *, tb=None, to=None):
    """cosine = normalize(features) @ normalize(weight).T  -> (B, O) float32."""
    B, D = features.shape
    O, Dw = weight.shape
    assert D == Dw, "in_features mismatch"

    f = features.astype(jnp.float32)
    w = weight.astype(jnp.float32)

    # ---- tile selection --------------------------------------------------
    O_pad = _round_up(O, to) if to is not None else _round_up(O, 128)
    if to is None:
        to = _pick_tile(O_pad, 512, 128)

    if tb is None:
        if B * D * 4 <= _FEAT_RESIDENT_BYTES:
            tb, B_pad = B, B          # fully resident: features DMA'd once
        else:
            B_pad = _round_up(B, 8)
            tb = _pick_tile(B_pad, 256, 8)
    else:
        B_pad = _round_up(B, tb)

    # Shrink tiles to stay within the default scoped-VMEM budget (all gens).
    while _vmem_estimate(tb, to, D) > _VMEM_BUDGET and to > 128:
        to = _pick_tile(O_pad, to - 128, 128)
    while _vmem_estimate(tb, to, D) > _VMEM_BUDGET and tb > 8:
        B_pad = _round_up(B, 8)
        tb = _pick_tile(B_pad, max(8, tb // 2), 8)
    # TODO(synk): for very large D (>~8k) add an inner K grid axis marked
    # "arbitrary" with an f32 VMEM accumulator (and/or raise vmem_limit_bytes
    # and use larger tiles on 128 MiB v5e/v6e parts) instead of shrinking tiles.
    assert B_pad % tb == 0 and O_pad % to == 0

    # ---- padding (zero rows -> norm clamps to eps -> exact-zero output) ---
    if B_pad != B:
        f = jnp.pad(f, ((0, B_pad - B), (0, 0)))
    if O_pad != O:
        w = jnp.pad(w, ((0, O_pad - O), (0, 0)))

    n_o, n_b = O_pad // to, B_pad // tb
    grid = (n_o, n_b)   # weight-tile axis outer; batch innermost (weight stays resident)

    out = pl.pallas_call(
        _arc_margin_kernel,
        out_shape=jax.ShapeDtypeStruct((B_pad, O_pad), jnp.float32),
        grid_spec=pltpu.PrefetchScalarGridSpec(
            num_scalar_prefetch=0,
            grid=grid,
            in_specs=[
                pl.BlockSpec((tb, D), lambda jo, ib: (ib, 0)),   # features
                pl.BlockSpec((to, D), lambda jo, ib: (jo, 0)),   # weight
            ],
            out_specs=pl.BlockSpec((tb, to), lambda jo, ib: (ib, jo)),
            scratch_shapes=[pltpu.VMEM((to, D), jnp.bfloat16)],
        ),
        compiler_params=pltpu.CompilerParams(
            # Batch axis "arbitrary": it carries the cached normalized-weight
            # scratch written at ib == 0.
            dimension_semantics=("parallel", "arbitrary"),
        ),
        cost_estimate=pl.CostEstimate(
            flops=2 * B_pad * O_pad * D,
            transcendentals=0,
            bytes_accessed=(B_pad * D + O_pad * D + B_pad * O_pad) * 4,
        ),
    )(f, w)

    if B_pad != B or O_pad != O:
        out = out[:B, :O]
    return out


if __name__ == "__main__":
    key = jax.random.PRNGKey(0)

    def run_case(B, in_features, out_features, k):
        k_feat, k_w = jax.random.split(k)
        features = jax.random.normal(k_feat, (B, in_features), dtype=jnp.float32)
        # Deterministic init matching reset_parameters(): uniform(-stdv, stdv)
        stdv = 1.0 / math.sqrt(in_features)
        weight = jax.random.uniform(
            k_w, (out_features, in_features), dtype=jnp.float32,
            minval=-stdv, maxval=stdv,
        )

        cosine = jax.block_until_ready(arc_margin_product(features, weight))

        # Pure-JAX reference (normalize-then-matmul, like the PyTorch module)
        f_n = features / jnp.maximum(
            jnp.linalg.norm(features, axis=1, keepdims=True), _EPS)
        w_n = weight / jnp.maximum(
            jnp.linalg.norm(weight, axis=1, keepdims=True), _EPS)
        ref = f_n @ w_n.T

        assert cosine.shape == (B, out_features)
        # bf16 MXU operands (f32 accumulation) -> looser tolerance than pure f32.
        err = float(jnp.max(jnp.abs(cosine - ref)))
        assert jnp.allclose(cosine, ref, atol=2e-2, rtol=2e-2), err

    k1, k2 = jax.random.split(key)
    run_case(8, 128, 256, k1)   # lane-aligned out_features
    run_case(8, 128, 200, k2)   # out_features padded to 256 and sliced back

    print("KERNEL_OK")
</pallas_src>

<mosaic_0001>
module attributes {stable_mosaic.version = 11 : i64} {
  func.func @_arc_margin_kernel(%arg0: i32, %arg1: i32, %arg2: memref<8x128xf32, #tpu.memory_space<vmem>>, %arg3: memref<256x128xf32, #tpu.memory_space<vmem>>, %arg4: memref<8x256xf32, #tpu.memory_space<vmem>>, %arg5: memref<256x128xbf16, #tpu.memory_space<vmem>>) attributes {dimension_semantics = [#tpu.dimension_semantics<parallel>, #tpu.dimension_semantics<arbitrary>], iteration_bounds = array<i64: 1, 1>, scalar_prefetch = 0 : i64, scratch_operands = 1 : i64, tpu.core_type = #tpu.core_type<tc>, window_params = [{transform_indices = @transform_0, window_bounds = array<i64: 8, 128>}, {transform_indices = @transform_1, window_bounds = array<i64: 256, 128>}, {transform_indices = @transform_2, window_bounds = array<i64: 8, 256>}]} {
    %c0_i32 = arith.constant 0 : i32
    %0 = arith.cmpi eq, %arg1, %c0_i32 : i32
    %1 = arith.extui %0 : i1 to i32
    %c0_i32_0 = arith.constant 0 : i32
    %2 = arith.cmpi ne, %1, %c0_i32_0 : i32
    scf.if %2 {
      %c0_9 = arith.constant 0 : index
      %c0_10 = arith.constant 0 : index
      %18 = vector.load %arg3[%c0_9, %c0_10] : memref<256x128xf32, #tpu.memory_space<vmem>>, vector<256x128xf32>
      %19 = arith.mulf %18, %18 : vector<256x128xf32>
      %cst_11 = arith.constant dense<0.000000e+00> : vector<256xf32>
      %20 = vector.multi_reduction <add>, %19, %cst_11 [1] : vector<256x128xf32> to vector<256xf32>
      %21 = vector.shape_cast %20 : vector<256xf32> to vector<256x1xf32>
      %22 = math.sqrt %21 : vector<256x1xf32>
      %cst_12 = arith.constant 9.99999996E-13 : f32
      %23 = vector.broadcast %cst_12 : f32 to vector<256x1xf32>
      %24 = arith.maximumf %22, %23 : vector<256x1xf32>
      %cst_13 = arith.constant 1.000000e+00 : f32
      %25 = vector.broadcast %cst_13 : f32 to vector<256x1xf32>
      %26 = arith.divf %25, %24 : vector<256x1xf32>
      %27 = vector.broadcast %26 : vector<256x1xf32> to vector<256x128xf32>
      %28 = arith.mulf %18, %27 : vector<256x128xf32>
      %29 = arith.truncf %28 : vector<256x128xf32> to vector<256x128xbf16>
      %c0_14 = arith.constant 0 : index
      %c0_15 = arith.constant 0 : index
      %30 = vector.load %arg5[%c0_14, %c0_15] : memref<256x128xbf16, #tpu.memory_space<vmem>>, vector<256x128xbf16>
      tpu.vector_store %arg5[%c0_14, %c0_15], %29 {strides = array<i32>} : memref<256x128xbf16, #tpu.memory_space<vmem>>, vector<256x128xbf16>,
    } else {
    }
    %c0 = arith.constant 0 : index
    %c0_1 = arith.constant 0 : index
    %3 = vector.load %arg2[%c0, %c0_1] : memref<8x128xf32, #tpu.memory_space<vmem>>, vector<8x128xf32>
    %4 = arith.mulf %3, %3 : vector<8x128xf32>
    %cst = arith.constant dense<0.000000e+00> : vector<8xf32>
    %5 = vector.multi_reduction <add>, %4, %cst [1] : vector<8x128xf32> to vector<8xf32>
    %6 = vector.shape_cast %5 : vector<8xf32> to vector<8x1xf32>
    %7 = math.sqrt %6 : vector<8x1xf32>
    %cst_2 = arith.constant 9.99999996E-13 : f32
    %8 = vector.broadcast %cst_2 : f32 to vector<8x1xf32>
    %9 = arith.maximumf %7, %8 : vector<8x1xf32>
    %cst_3 = arith.constant 1.000000e+00 : f32
    %10 = vector.broadcast %cst_3 : f32 to vector<8x1xf32>
    %11 = arith.divf %10, %9 : vector<8x1xf32>
    %12 = arith.truncf %3 : vector<8x128xf32> to vector<8x128xbf16>
    %c0_4 = arith.constant 0 : index
    %c0_5 = arith.constant 0 : index
    %13 = vector.load %arg5[%c0_4, %c0_5] : memref<256x128xbf16, #tpu.memory_space<vmem>>, vector<256x128xbf16>
    %cst_6 = arith.constant dense<0.000000e+00> : vector<8x256xf32>
    %14 = tpu.matmul %12, %13, %cst_6 {dimension_numbers = #tpu.dot_dimension_numbers<[1], [1], [0], [0], [0, 0, 1, 0], [], []>} : vector<8x128xbf16>, vector<256x128xbf16>, vector<8x256xf32> -> vector<8x256xf32>
    %15 = vector.broadcast %11 : vector<8x1xf32> to vector<8x256xf32>
    %16 = arith.mulf %14, %15 : vector<8x256xf32>
    %c0_7 = arith.constant 0 : index
    %c0_8 = arith.constant 0 : index
    %17 = vector.load %arg4[%c0_7, %c0_8] : memref<8x256xf32, #tpu.memory_space<vmem>>, vector<8x256xf32>
    tpu.vector_store %arg4[%c0_7, %c0_8], %16 {strides = array<i32>} : memref<8x256xf32, #tpu.memory_space<vmem>>, vector<8x256xf32>,
    return
  }
  func.func @transform_0(%arg0: i32, %arg1: i32) -> (i32, i32) {
    %c0_i32 = arith.constant 0 : i32
    %c0_i32_0 = arith.constant 0 : i32
    return %arg1, %c0_i32 : i32, i32
  }
  func.func @transform_1(%arg0: i32, %arg1: i32) -> (i32, i32) {
    %c0_i32 = arith.constant 0 : i32
    %c0_i32_0 = arith.constant 0 : i32
    return %arg0, %c0_i32 : i32, i32
  }
  func.func @transform_2(%arg0: i32, %arg1: i32) -> (i32, i32) {
    %c0_i32 = arith.constant 0 : i32
    return %arg1, %arg0 : i32, i32
  }
}

</mosaic_0001>

<bundles_post_ra>
// kernel: tpu_custom_call.1
= control target key start
LH: loop header
LB: loop body
LE: loop exit
PB: predicated region body
PF: predicated region fallthrough
CT: control target
= control target key end

     0   :  { %7 = vsyncpa [#allocation4], 0  ;;  %s1482_s0 = inlined_call_operand.hbm [shape: f32[8,128], index: 0, kind: input, shape index: {}]   ;;  %s1483_s1 = inlined_call_operand.hbm [shape: f32[256,128], index: 1, kind: input, shape index: {}]   ;;  %s1484_s2 = inlined_call_operand.hbm [shape: f32[8,256], index: 2, kind: output, shape index: {}]  }
   0x1   :  { %8 = vsyncpa [#allocation7], 0 }
   0x2   :  { %9 = vsyncpa [#allocation5], 0  ;;  %s874_s9 = smov [#allocation3]   ;;  %s875_s11 = smov [#allocation6]  }
   0x3   :  { %s16_s10 = sshll.u32 %s874_s9, 4  ;;  %s25_s12 = sshll.u32 %s875_s11, 4  ;;  %s17_s10 = int_to_ptr.vmem [resolvable:$true] %s16_s10  ;;  %s894_s12 = int_to_ptr.vmem [resolvable:$true] %s25_s12 }
   0x4   :  { %s802_s15 = scalar_lea.hbm %s1482_s0, 128 }
   0x5   :  { %p803_p0 = scmp.ne.s32.totalorder %s1482_s0, %s802_s15  ;;  %p806_p1 = scmp.lt.u32.totalorder %s802_s15, %s1482_s0 }
   0x7   :  { %p808_p2 = pnand %p806_p1, %p803_p0 }
   0x9   :  { %811 = shalt.err (!%p808_p2)
}
   0xa   :  { %s812_s20 = scalar_lea.vmem %s17_s10, 128  ;;  %p817_p4 = scmp.lt.s32.totalorder %s17_s10, %s17_s10 }
   0xb   :  { %p813_p3 = scmp.ne.s32.totalorder %s17_s10, %s812_s20  ;;  %p818_p5 = scmp.lt.s32.totalorder %s812_s20, %s812_s20 }
   0xd   :  { %p819_p6 = por %p818_p5, %p817_p4 }
   0xf   :  { %p820_p7 = pnand %p819_p6, %p813_p3 }
  0x11   :  { %823 = shalt.err (!%p820_p7)
}
  0x12   :  { %19 = dma.hbm_to_vmem [thread:$0]  %s1482_s0, 128, %s17_s10, [#allocation4]  }
  0x13   :  { %s824_s25 = scalar_lea.hbm %s1483_s1, 4096 }
  0x14   :  { %p825_p8 = scmp.ne.s32.totalorder %s1483_s1, %s824_s25  ;;  %p828_p9 = scmp.lt.u32.totalorder %s824_s25, %s1483_s1 }
  0x16   :  { %p830_p10 = pnand %p828_p9, %p825_p8 }
  0x18   :  { %833 = shalt.err (!%p830_p10)
}
  0x19   :  { %s834_s30 = scalar_lea.vmem %s894_s12, 4096  ;;  %p839_p12 = scmp.lt.s32.totalorder %s894_s12, %s894_s12 }
  0x1a   :  { %p835_p11 = scmp.ne.s32.totalorder %s894_s12, %s834_s30  ;;  %p840_p13 = scmp.lt.s32.totalorder %s834_s30, %s834_s30 }
  0x1c   :  { %p841_p0 = por %p840_p13, %p839_p12 }
  0x1e   :  { %p842_p1 = pnand %p841_p0, %p835_p11 }
  0x20   :  { %845 = shalt.err (!%p842_p1)
}
  0x21   :  { %s876_s0 = smov 128   ;;  %s877_s3 = smov 8  }
  0x22   :  { %31 = dma.hbm_to_vmem [thread:$0]  %s1483_s1, 4096, %s894_s12, [#allocation7], %s876_s0, %s876_s0, %s877_s3  }
  0x23   :  { %868 = dma.done.wait [#allocation4], 128  }
  0x24   :  { %869 = vsyncadd [#allocation4], 4294967168 }
  0x25   :  { %870 = dma.done.wait [#allocation7], 4096  }
  0x26   :  { %871 = vsyncadd [#allocation7], 4294963200  ;;  %v925_v0 = vld [vmem:[#allocation6 + $0x80] sm:$0xff]  ;;  %v929_v2 = vld [vmem:[#allocation6 + $0x88] sm:$0xff]  ;;  %s878_s1 = smov [#allocation8]  }
  0x27   :  { %v927_v1 = vld [vmem:[#allocation6] sm:$0xff]  ;;  %v91_v3 = vmul.f32 %v925_v0, %v925_v0  ;;  %v935_v5 = vld [vmem:[#allocation6 + $0x8] sm:$0xff]  ;;  %v92_v6 = vmul.f32 %v929_v2, %v929_v2  ;;  %v941_v8 = vld [vmem:[#allocation6 + $0x90] sm:$0xff]  ;;  %s637_s6 = sshll.u32 %s878_s1, 4  ;;  %s638_s6 = int_to_ptr.vmem [resolvable:$true] %s637_s6 }
  0x28   :  { %v75_v4 = vmul.f32 %v927_v1, %v927_v1  ;;  %v76_v7 = vmul.f32 %v935_v5, %v935_v5  ;;  %v943_v9 = vld [vmem:[#allocation6 + $0x98] sm:$0xff]  ;;  %v93_v10 = vmul.f32 %v941_v8, %v941_v8  ;;  %v949_v12 = vld [vmem:[#allocation6 + $0x10] sm:$0xff]  ;;  %v957_v16 = vld [vmem:[#allocation6 + $0xa0] sm:$0xff]  ;;  %s846_s7 = scalar_lea.vmem %s638_s6, 256  ;;  %p851_p3 = scmp.lt.s32.totalorder %s638_s6, %s638_s6 }
  0x29   :  { %139 = vadd.xlane.f32.xlu0 %v91_v3  ;;  %v94_v11 = vmul.f32 %v943_v9, %v943_v9  ;;  %v951_v13 = vld [vmem:[#allocation6 + $0x18] sm:$0xff]  ;;  %v77_v14 = vmul.f32 %v949_v12, %v949_v12  ;;  %v959_v17 = vld [vmem:[#allocation6 + $0xa8] sm:$0xff]  ;;  %v95_v18 = vmul.f32 %v957_v16, %v957_v16  ;;  %v965_v20 = vld [vmem:[#allocation6 + $0x20] sm:$0xff]  ;;  %p847_p2 = scmp.ne.s32.totalorder %s638_s6, %s846_s7  ;;  %p852_p4 = scmp.lt.s32.totalorder %s846_s7, %s846_s7 }
  0x2a   :  { %107 = vadd.xlane.f32.xlu1 %v75_v4  ;;  %v78_v15 = vmul.f32 %v951_v13, %v951_v13  ;;  %v96_v19 = vmul.f32 %v959_v17, %v959_v17  ;;  %v967_v21 = vld [vmem:[#allocation6 + $0x28] sm:$0xff]  ;;  %v79_v22 = vmul.f32 %v965_v20, %v965_v20  ;;  %v973_v24 = vld [vmem:[#allocation6 + $0xb0] sm:$0xff]  ;;  %v975_v25 = vld [vmem:[#allocation6 + $0xb8] sm:$0xff] }
  0x2b   :  { %v80_v23 = vmul.f32 %v967_v21, %v967_v21  ;;  %v97_v26 = vmul.f32 %v973_v24, %v973_v24  ;;  %v98_v27 = vmul.f32 %v975_v25, %v975_v25  ;;  %v981_v28 = vld [vmem:[#allocation6 + $0x30] sm:$0xff]  ;;  %v983_v29 = vld [vmem:[#allocation6 + $0x38] sm:$0xff]  ;;  %v989_v32 = vld [vmem:[#allocation6 + $0xc0] sm:$0xff]  ;;  %p853_p5 = por %p852_p4, %p851_p3 }
  0x2c   :  { %v81_v30 = vmul.f32 %v981_v28, %v981_v28  ;;  %v82_v31 = vmul.f32 %v983_v29, %v983_v29  ;;  %v991_v33 = vld [vmem:[#allocation6 + $0xc8] sm:$0xff]  ;;  %v99_v34 = vmul.f32 %v989_v32, %v989_v32  ;;  %v997_v36 = vld [vmem:[#allocation6 + $0x40] sm:$0xff]  ;;  %v1005_v40 = vld [vmem:[#allocation6 + $0xd0] sm:$0xff] }
  0x2d   :  { %141 = vadd.xlane.f32.xlu0 %v92_v6  ;;  %v100_v35 = vmul.f32 %v991_v33, %v991_v33  ;;  %v999_v37 = vld [vmem:[#allocation6 + $0x48] sm:$0xff]  ;;  %v83_v38 = vmul.f32 %v997_v36, %v997_v36  ;;  %v1007_v41 = vld [vmem:[#allocation6 + $0xd8] sm:$0xff]  ;;  %v101_v42 = vmul.f32 %v1005_v40, %v1005_v40  ;;  %v1013_v44 = vld [vmem:[#allocation6 + $0x50] sm:$0xff]  ;;  %p854_p6 = pnand %p853_p5, %p847_p2 }
  0x2e   :  { %109 = vadd.xlane.f32.xlu1 %v76_v7  ;;  %v84_v39 = vmul.f32 %v999_v37, %v999_v37  ;;  %v102_v43 = vmul.f32 %v1007_v41, %v1007_v41  ;;  %v1015_v45 = vld [vmem:[#allocation6 + $0x58] sm:$0xff]  ;;  %v85_v46 = vmul.f32 %v1013_v44, %v1013_v44  ;;  %v1021_v48 = vld [vmem:[#allocation6 + $0xe0] sm:$0xff]  ;;  %v1023_v49 = vld [vmem:[#allocation6 + $0xe8] sm:$0xff] }
  0x2f   :  { %v86_v47 = vmul.f32 %v1015_v45, %v1015_v45  ;;  %v103_v50 = vmul.f32 %v1021_v48, %v1021_v48  ;;  %v104_v51 = vmul.f32 %v1023_v49, %v1023_v49  ;;  %v1029_v52 = vld [vmem:[#allocation6 + $0x60] sm:$0xff]  ;;  %v1031_v53 = vld [vmem:[#allocation6 + $0x68] sm:$0xff]  ;;  %v1037_v56 = vld [vmem:[#allocation6 + $0xf0] sm:$0xff] }
  0x30   :  { %v87_v54 = vmul.f32 %v1029_v52, %v1029_v52  ;;  %v88_v55 = vmul.f32 %v1031_v53, %v1031_v53  ;;  %v1039_v57 = vld [vmem:[#allocation6 + $0xf8] sm:$0xff]  ;;  %v105_v58 = vmul.f32 %v1037_v56, %v1037_v56  ;;  %v1045_v60 = vld [vmem:[#allocation6 + $0x70] sm:$0xff] }
  0x31   :  { %143 = vadd.xlane.f32.xlu0 %v93_v10  ;;  %v106_v59 = vmul.f32 %v1039_v57, %v1039_v57  ;;  %1488 = vst [vmem:[#allocation12_spill] sm:$0xff] %v1045_v60  ;;  %v1047_v61 = vld [vmem:[#allocation6 + $0x78] sm:$0xff]  ;;  %v89_v62 = vmul.f32 %v1045_v60, %v1045_v60 }
  0x32   :  { %145 = vadd.xlane.f32.xlu1 %v94_v11  ;;  %1489 = vst [vmem:[#allocation13_spill] sm:$0xff] %v1047_v61  ;;  %v90_v63 = vmul.f32 %v1047_v61, %v1047_v61  ;;  %v555_v3 = vld [vmem:[#allocation3] sm:$0xff] }
  0x33   :  { %v1053_v4 = vpack.c.bf16 %v555_v3, %v555_v3  ;;  %v556_v6 = vmul.f32 %v555_v3, %v555_v3 }
  0x35   :  { %111 = vadd.xlane.f32.xlu0 %v77_v14  ;;  %1490 = vst [vmem:[#allocation14_spill] sm:$0xff] %v1053_v4  ;;  %663 = vmatprep.mubr.bf16.mxu0 %v1053_v4 }
  0x36   :  { %113 = vadd.xlane.f32.xlu1 %v78_v15 }
  0x39   :  { %147 = vadd.xlane.f32.xlu0 %v95_v18 }
  0x3a   :  { %149 = vadd.xlane.f32.xlu1 %v96_v19 }
  0x3d   :  { %115 = vadd.xlane.f32.xlu0 %v79_v22 }
  0x3e   :  { %117 = vadd.xlane.f32.xlu1 %v80_v23 }
  0x41   :  { %151 = vadd.xlane.f32.xlu0 %v97_v26 }
  0x42   :  { %153 = vadd.xlane.f32.xlu1 %v98_v27 }
  0x45   :  { %119 = vadd.xlane.f32.xlu0 %v81_v30 }
  0x46   :  { %121 = vadd.xlane.f32.xlu1 %v82_v31 }
  0x49   :  { %155 = vadd.xlane.f32.xlu0 %v99_v34 }
  0x4a   :  { %157 = vadd.xlane.f32.xlu1 %v100_v35 }
  0x4d   :  { %123 = vadd.xlane.f32.xlu0 %v83_v38 }
  0x4e   :  { %125 = vadd.xlane.f32.xlu1 %v84_v39 }
  0x51   :  { %159 = vadd.xlane.f32.xlu0 %v101_v42 }
  0x52   :  { %161 = vadd.xlane.f32.xlu1 %v102_v43 }
  0x55   :  { %127 = vadd.xlane.f32.xlu0 %v85_v46 }
  0x56   :  { %129 = vadd.xlane.f32.xlu1 %v86_v47 }
  0x59   :  { %163 = vadd.xlane.f32.xlu0 %v103_v50 }
  0x5a   :  { %165 = vadd.xlane.f32.xlu1 %v104_v51 }
  0x5d   :  { %131 = vadd.xlane.f32.xlu0 %v87_v54 }
  0x5e   :  { %133 = vadd.xlane.f32.xlu1 %v88_v55 }
  0x61   :  { %167 = vadd.xlane.f32.xlu0 %v105_v58 }
  0x62   :  { %169 = vadd.xlane.f32.xlu1 %v106_v59 }
  0x65   :  { %135 = vadd.xlane.f32.xlu0 %v89_v62 }
  0x66   :  { %137 = vadd.xlane.f32.xlu1 %v90_v63 }
  0x69   :  { %557 = vadd.xlane.f32.xlu0 %v556_v6 }
  0xb6   :  { %v140_v7 = vpop.xlane.xlu0 %139 }
  0xb7   :  { %v108_v10 = vpop.xlane.xlu1 %107  ;;  %670 = vrsqrt.f32 %v140_v7  ;;  %vm285_vm0 = vcmp.eq.f32.partialorder %v140_v7, inf  ;;  %vm287_vm1 = vcmp.eq.f32.partialorder %v140_v7, 0.0  ;;  %v288_v31 = vand.u32 2147483648, %v140_v7 }
  0xb8   :  { %672 = vrsqrt.f32 %v108_v10  ;;  %vm173_vm2 = vcmp.eq.f32.partialorder %v108_v10, inf  ;;  %vm175_vm3 = vcmp.eq.f32.partialorder %v108_v10, 0.0  ;;  %v176_v34 = vand.u32 2147483648, %v108_v10 }
  0xba   :  { %v1056_v11 = vpop.xlane.xlu0 %141 }
  0xbb   :  { %v1058_v14 = vpop.xlane.xlu1 %109  ;;  %674 = vrsqrt.f32 %v1056_v11  ;;  %vm292_vm4 = vcmp.eq.f32.partialorder %v1056_v11, inf }
  0xbc   :  { %676 = vrsqrt.f32 %v1058_v14  ;;  %v183_v38 = vand.u32 2147483648, %v1058_v14  ;;  %vm180_vm5 = vcmp.eq.f32.partialorder %v1058_v14, inf  ;;  %vm182_vm12 = vcmp.eq.f32.partialorder %v1058_v14, 0.0 }
  0xbe   :  { %v144_v15 = vpop.xlane.xlu0 %143 }
  0xbf   :  { %v1062_v18 = vpop.xlane.xlu1 %145  ;;  %678 = vrsqrt.f32 %v144_v15  ;;  %vm299_vm6 = vcmp.eq.f32.partialorder %v144_v15, inf  ;;  %vm301_vm7 = vcmp.eq.f32.partialorder %v144_v15, 0.0  ;;  %v302_v51 = vand.u32 2147483648, %v144_v15 }
  0xc0   :  { %680 = vrsqrt.f32 %v1062_v18  ;;  %vm306_vm8 = vcmp.eq.f32.partialorder %v1062_v18, inf  ;;  %vm308_vm9 = vcmp.eq.f32.partialorder %v1062_v18, 0.0  ;;  %v309_v55 = vand.u32 2147483648, %v1062_v18 }
  0xc1   :  { %v671_v19 = vpop.eup %670 }
  0xc2   :  { %v673_v22 = vpop.eup %672  ;;  %v1065_v23 = vpop.xlane.xlu0 %111  ;;  %v284_v27 = vmul.f32 %v671_v19, %v140_v7 }
  0xc3   :  { %v1067_v26 = vpop.xlane.xlu1 %113  ;;  %682 = vrsqrt.f32 %v1065_v23  ;;  %v172_v30 = vmul.f32 %v673_v22, %v108_v10  ;;  %vm187_vm10 = vcmp.eq.f32.partialorder %v1065_v23, inf  ;;  %vm189_vm11 = vcmp.eq.f32.partialorder %v1065_v23, 0.0 }
  0xc4   :  { %684 = vrsqrt.f32 %v1067_v26  ;;  %v286_v46 = vsel %vm285_vm0, %v140_v7, %v284_v27  ;;  %v190_v62 = vand.u32 2147483648, %v1065_v23  ;;  %vm194_vm13 = vcmp.eq.f32.partialorder %v1067_v26, inf }
  0xc5   :  { %v675_v43 = vpop.eup %674  ;;  %v174_v50 = vsel %vm173_vm2, %v108_v10, %v172_v30  ;;  %v289_v6 = vsel %vm287_vm1, %v288_v31, %v286_v46  ;;  %vm196_vm14 = vcmp.eq.f32.partialorder %v1067_v26, 0.0  ;;  %v197_v31 = vand.u32 2147483648, %v1067_v26 }
  0xc6   :  { %v1074_v39 = vpop.xlane.xlu0 %147  ;;  %v677_v47 = vpop.eup %676  ;;  %v1095_v19 = vsel %vm175_vm3, %v176_v34, %v174_v50  ;;  %v291_v22 = vmul.f32 %v675_v43, %v1056_v11  ;;  %v411_v34 = vmax.f32 %v289_v6, 1e-12  ;;  %vm294_vm1 = vcmp.eq.f32.partialorder %v1056_v11, 0.0 }
  0xc7   :  { %v1076_v42 = vpop.xlane.xlu1 %149  ;;  %686 = vrsqrt.f32 %v1074_v39  ;;  %v179_v30 = vmul.f32 %v677_v47, %v1058_v14  ;;  %vm313_vm15 = vcmp.eq.f32.partialorder %v1074_v39, inf  ;;  %vm315_vm0 = vcmp.eq.f32.partialorder %v1074_v39, 0.0 }
  0xc8   :  { %688 = vrsqrt.f32 %v1076_v42  ;;  %v316_v6 = vand.u32 2147483648, %v1074_v39  ;;  %vm320_vm2 = vcmp.eq.f32.partialorder %v1076_v42, inf  ;;  %vm322_vm3 = vcmp.eq.f32.partialorder %v1076_v42, 0.0 }
  0xc9   :  { %v679_v54 = vpop.eup %678 }
  0xca   :  { %v681_v58 = vpop.eup %680  ;;  %v298_v59 = vmul.f32 %v679_v54, %v144_v15  ;;  %v1089_v63 = vpop.xlane.xlu0 %115 }
  0xcb   :  { %v1091_v3 = vpop.xlane.xlu1 %117  ;;  %v305_v27 = vmul.f32 %v681_v58, %v1062_v18  ;;  %690 = vrsqrt.f32 %v1089_v63 }
  0xcc   :  { %v300_v54 = vsel %vm299_vm6, %v144_v15, %v298_v59  ;;  %692 = vrsqrt.f32 %v1091_v3  ;;  %vm208_vm6 = vcmp.eq.f32.partialorder %v1091_v3, inf }
  0xcd   :  { %v683_v35 = vpop.eup %682  ;;  %v303_v7 = vsel %vm301_vm7, %v302_v51, %v300_v54  ;;  %v307_v10 = vsel %vm306_vm8, %v1062_v18, %v305_v27  ;;  %v293_v51 = vsel %vm292_vm4, %v1056_v11, %v291_v22  ;;  %v181_v18 = vsel %vm180_vm5, %v1058_v14, %v179_v30 }
  0xce   :  { %v685_v43 = vpop.eup %684  ;;  %v310_v47 = vsel %vm308_vm9, %v309_v55, %v307_v10  ;;  %v186_v50 = vmul.f32 %v683_v35, %v1065_v23  ;;  %v1114_v58 = vpop.xlane.xlu0 %151  ;;  %v413_v35 = vmax.f32 %v303_v7, 1e-12  ;;  %vm201_vm4 = vcmp.eq.f32.partialorder %v1089_v63, inf }
  0xcf   :  { %v1116_v15 = vpop.xlane.xlu1 %153  ;;  %v193_v59 = vmul.f32 %v685_v43, %v1067_v26  ;;  %694 = vrsqrt.f32 %v1114_v58  ;;  %v414_v22 = vmax.f32 %v310_v47, 1e-12  ;;  %vm203_vm5 = vcmp.eq.f32.partialorder %v1089_v63, 0.0 }
  0xd0   :  { %v188_v55 = vsel %vm187_vm10, %v1065_v23, %v186_v50  ;;  %696 = vrsqrt.f32 %v1116_v15  ;;  %vm210_vm7 = vcmp.eq.f32.partialorder %v1091_v3, 0.0  ;;  %vm327_vm8 = vcmp.eq.f32.partialorder %v1114_v58, inf }
  0xd1   :  { %v687_v27 = vpop.eup %686  ;;  %v191_v54 = vsel %vm189_vm11, %v190_v62, %v188_v55  ;;  %v195_v10 = vsel %vm194_vm13, %v1067_v26, %v193_v59  ;;  %v1151_v62 = vsel %vm182_vm12, %v183_v38, %v181_v18  ;;  %v323_v26 = vand.u32 2147483648, %v1076_v42 }
  0xd2   :  { %v689_v30 = vpop.eup %688  ;;  %v198_v7 = vsel %vm196_vm14, %v197_v31, %v195_v10  ;;  %v312_v43 = vmul.f32 %v687_v27, %v1074_v39  ;;  %v1143_v47 = vpop.xlane.xlu0 %119  ;;  %698 = vrcp.f32 %v411_v34  ;;  %v397_v31 = vmax.f32 %v191_v54, 1e-12 }
  0xd3   :  { %v1145_v23 = vpop.xlane.xlu1 %121  ;;  %v319_v50 = vmul.f32 %v689_v30, %v1076_v42  ;;  %700 = vrcp.f32 %v413_v35  ;;  %v398_v27 = vmax.f32 %v198_v7, 1e-12  ;;  %v211_v30 = vand.u32 2147483648, %v1091_v3 }
  0xd4   :  { %v314_v59 = vsel %vm313_vm15, %v1074_v39, %v312_v43  ;;  %702 = vrcp.f32 %v414_v22  ;;  %v204_v39 = vand.u32 2147483648, %v1089_v63  ;;  %vm329_vm9 = vcmp.eq.f32.partialorder %v1114_v58, 0.0 }
  0xd5   :  { %v691_v55 = vpop.eup %690  ;;  %v317_v14 = vsel %vm315_vm0, %v316_v6, %v314_v59  ;;  %v321_v38 = vsel %vm320_vm2, %v1076_v42, %v319_v50  ;;  %704 = vrsqrt.f32 %v1143_v47  ;;  %vm334_vm10 = vcmp.eq.f32.partialorder %v1116_v15, inf }
  0xd6   :  { %v693_v18 = vpop.eup %692  ;;  %v324_v34 = vsel %vm322_vm3, %v323_v26, %v321_v38  ;;  %v200_v35 = vmul.f32 %v691_v55, %v1089_v63  ;;  %v1169_v54 = vpop.xlane.xlu0 %155  ;;  %706 = vrsqrt.f32 %v1145_v23  ;;  %v415_v42 = vmax.f32 %v317_v14, 1e-12 }
  0xd7   :  { %v1171_v22 = vpop.xlane.xlu1 %157  ;;  %v207_v6 = vmul.f32 %v693_v18, %v1091_v3  ;;  %708 = vrcp.f32 %v397_v31  ;;  %v416_v43 = vmax.f32 %v324_v34, 1e-12  ;;  %v1491_v55 = vand.u32 2147483648, %v1056_v11 }
  0xd8   :  { %v202_v10 = vsel %vm201_vm4, %v1089_v63, %v200_v35  ;;  %710 = vrcp.f32 %v398_v27  ;;  %v396_v14 = vmax.f32 %v1151_v62, 1e-12  ;;  %v330_v34 = vand.u32 2147483648, %v1114_v58 }
  0xd9   :  { %v695_v7 = vpop.eup %694  ;;  %v205_v50 = vsel %vm203_vm5, %v204_v39, %v202_v10  ;;  %v209_v26 = vsel %vm208_vm6, %v1091_v3, %v207_v6  ;;  %712 = vrsqrt.f32 %v1169_v54  ;;  %v296_v63 = vsel %vm294_vm1, %v1491_v55, %v293_v51 }
  0xda   :  { %v326_v59 = vmul.f32 %v695_v7, %v1114_v58  ;;  %v1185_v31 = vpop.xlane.xlu0 %123  ;;  %v212_v27 = vsel %vm210_vm7, %v211_v30, %v209_v26  ;;  %714 = vrsqrt.f32 %v1171_v22  ;;  %v697_v3 = vpop.eup %696  ;;  %v399_v18 = vmax.f32 %v205_v50, 1e-12 }
  0xdb   :  { %v1194_v38 = vpop.xlane.xlu1 %125  ;;  %716 = vrcp.f32 %v415_v42  ;;  %v333_v11 = vmul.f32 %v697_v3, %v1116_v15  ;;  %vm336_vm11 = vcmp.eq.f32.partialorder %v1116_v15, 0.0  ;;  %v400_v62 = vmax.f32 %v212_v27, 1e-12 }
  0xdc   :  { %v1198_v35 = vpop.eup %698  ;;  %718 = vrcp.f32 %v416_v43  ;;  %v328_v39 = vsel %vm327_vm8, %v1114_v58, %v326_v59  ;;  %v337_v6 = vand.u32 2147483648, %v1116_v15  ;;  %vm215_vm12 = vcmp.eq.f32.partialorder %v1143_v47, inf }
  0xdd   :  { %v1203_v51 = vpop.eup %700  ;;  %720 = vrsqrt.f32 %v1185_v31  ;;  %vm217_vm13 = vcmp.eq.f32.partialorder %v1143_v47, 0.0  ;;  %v218_v30 = vand.u32 2147483648, %v1143_v47  ;;  %vm222_vm14 = vcmp.eq.f32.partialorder %v1145_v23, inf }
  0xde   :  { %v1208_v42 = vpop.xlane.xlu0 %159  ;;  %v1210_v10 = vpop.eup %702  ;;  %722 = vrsqrt.f32 %v1194_v38  ;;  %vm224_vm15 = vcmp.eq.f32.partialorder %v1145_v23, 0.0  ;;  %v225_v43 = vand.u32 2147483648, %v1145_v23  ;;  %v331_v26 = vsel %vm329_vm9, %v330_v34, %v328_v39 }
  0xdf   :  { %v705_v7 = vpop.eup %704  ;;  %724 = vrcp.f32 %v399_v18  ;;  %v335_v59 = vsel %vm334_vm10, %v1116_v15, %v333_v11  ;;  %v412_v27 = vmax.f32 %v296_v63, 1e-12  ;;  %v1225_v3 = vpop.xlane.xlu1 %161  ;;  %vm341_vm0 = vcmp.eq.f32.partialorder %v1169_v54, inf }
  0xe0   :  { %v707_v50 = vpop.eup %706  ;;  %v214_v55 = vmul.f32 %v705_v7, %v1143_v47  ;;  %726 = vrcp.f32 %v400_v62  ;;  %vm343_vm1 = vcmp.eq.f32.partialorder %v1169_v54, 0.0  ;;  %v344_v11 = vand.u32 2147483648, %v1169_v54 }
  0xe1   :  { %v1227_v18 = vpop.eup %708  ;;  %v221_v46 = vmul.f32 %v707_v50, %v1145_v23  ;;  %vm348_vm2 = vcmp.eq.f32.partialorder %v1171_v22, inf  ;;  %v1492_v63 = vmax.f32 %v1095_v19, 1e-12  ;;  %v417_v39 = vmax.f32 %v331_v26, 1e-12 }
  0xe2   :  { %v1232_v58 = vpop.eup %710  ;;  %v216_v34 = vsel %vm215_vm12, %v1143_v47, %v214_v55  ;;  %v338_v7 = vsel %vm336_vm11, %v337_v6, %v335_v59  ;;  %v1246_v4 = vpop.xlane.xlu0 %127  ;;  %vm350_vm3 = vcmp.eq.f32.partialorder %v1171_v22, 0.0  ;;  %v351_v6 = vand.u32 2147483648, %v1171_v22 }
  0xe3   :  { %728 = vrcp.f32 %v1492_v63  ;;  %v713_v62 = vpop.eup %712  ;;  %v223_v50 = vsel %vm222_vm14, %v1145_v23, %v221_v46  ;;  %v219_v61 = vsel %vm217_vm13, %v218_v30, %v216_v34  ;;  %vm229_vm4 = vcmp.eq.f32.partialorder %v1185_v31, inf  ;;  %v1266_v30 = vpop.xlane.xlu1 %129 }
  0xe4   :  { %730 = vrcp.f32 %v412_v27  ;;  %v715_v55 = vpop.eup %714  ;;  %v340_v60 = vmul.f32 %v713_v62, %v1169_v54  ;;  %v418_v26 = vmax.f32 %v338_v7, 1e-12  ;;  %v226_v47 = vsel %vm224_vm15, %v225_v43, %v223_v50 }
  0xe5   :  { %732 = vrcp.f32 %v396_v14  ;;  %v1252_v19 = vpop.eup %716  ;;  %v347_v15 = vmul.f32 %v715_v55, %v1171_v22  ;;  %vm231_vm5 = vcmp.eq.f32.partialorder %v1185_v31, 0.0  ;;  %v401_v27 = vmax.f32 %v219_v61, 1e-12 }
  0xe6   :  { %734 = vrsqrt.f32 %v1208_v42  ;;  %v1258_v46 = vpop.eup %718  ;;  %v342_v14 = vsel %vm341_vm0, %v1169_v54, %v340_v60  ;;  %v232_v63 = vand.u32 2147483648, %v1185_v31  ;;  %vm236_vm6 = vcmp.eq.f32.partialorder %v1194_v38, inf  ;;  %v1282_v54 = vpop.xlane.xlu0 %163 }
  0xe7   :  { %v721_v59 = vpop.eup %720  ;;  %736 = vrcp.f32 %v417_v39  ;;  %v345_v34 = vsel %vm343_vm1, %v344_v11, %v342_v14  ;;  %v349_v23 = vsel %vm348_vm2, %v1171_v22, %v347_v15  ;;  %v402_v39 = vmax.f32 %v226_v47, 1e-12  ;;  %v1303_v22 = vpop.xlane.xlu1 %165 }
  0xe8   :  { %v723_v62 = vpop.eup %722  ;;  %v228_v43 = vmul.f32 %v721_v59, %v1185_v31  ;;  %738 = vrsqrt.f32 %v1225_v3  ;;  %vm238_vm7 = vcmp.eq.f32.partialorder %v1194_v38, 0.0  ;;  %v419_v11 = vmax.f32 %v345_v34, 1e-12 }
  0xe9   :  { %v1277_v60 = vpop.eup %724  ;;  %v235_v61 = vmul.f32 %v723_v62, %v1194_v38  ;;  %740 = vrsqrt.f32 %v1246_v4  ;;  %v239_v7 = vand.u32 2147483648, %v1194_v38  ;;  %v507_v50 = vmul.f32 %v1198_v35, %v925_v0 }
  0xea   :  { %742 = vrcp.f32 %v418_v26  ;;  %v1287_v55 = vpop.eup %726  ;;  %v352_v15 = vsel %vm350_vm3, %v351_v6, %v349_v23  ;;  %vm355_vm8 = vcmp.eq.f32.partialorder %v1208_v42, inf  ;;  %v509_v47 = vmul.f32 %v1203_v51, %v941_v8 }
  0xeb   :  { %744 = vrcp.f32 %v401_v27  ;;  %v230_v26 = vsel %vm229_vm4, %v1185_v31, %v228_v43  ;;  %v237_v0 = vsel %vm236_vm6, %v1194_v38, %v235_v61  ;;  %v510_v35 = vmul.f32 %v1210_v10, %v943_v9  ;;  %v1316_v43 = vpop.xlane.xlu0 %131 }
  0xec   :  { %746 = vrsqrt.f32 %v1266_v30  ;;  %vm357_vm9 = vcmp.eq.f32.partialorder %v1208_v42, 0.0  ;;  %v358_v8 = vand.u32 2147483648, %v1208_v42  ;;  %vm362_vm10 = vcmp.eq.f32.partialorder %v1225_v3, inf }
  0xed   :  { %v729_v14 = vpop.eup %728  ;;  %748 = vrcp.f32 %v402_v39  ;;  %v420_v59 = vmax.f32 %v352_v15, 1e-12  ;;  %vm364_vm11 = vcmp.eq.f32.partialorder %v1225_v3, 0.0  ;;  %v233_v10 = vsel %vm231_vm5, %v232_v63, %v230_v26 }
  0xee   :  { %v731_v6 = vpop.eup %730  ;;  %750 = vrcp.f32 %v419_v11  ;;  %v240_v34 = vsel %vm238_vm7, %v239_v7, %v237_v0  ;;  %v491_v62 = vmul.f32 %v729_v14, %v927_v1  ;;  %v532_v11 = vpack.c.bf16 %v510_v35, %v509_v47 }
  0xef   :  { %v733_v51 = vpop.eup %732  ;;  %v508_v27 = vmul.f32 %v731_v6, %v929_v2  ;;  %752 = vrsqrt.f32 %v1282_v54  ;;  %v365_v31 = vand.u32 2147483648, %v1225_v3  ;;  %vm243_vm12 = vcmp.eq.f32.partialorder %v1246_v4, inf }
  0xf0   :  { %v735_v9 = vpop.eup %734  ;;  %v492_v23 = vmul.f32 %v733_v51, %v935_v5  ;;  %754 = vrsqrt.f32 %v1303_v22  ;;  %v403_v38 = vmax.f32 %v233_v10, 1e-12  ;;  %v404_v5 = vmax.f32 %v240_v34, 1e-12  ;;  %v1351_v51 = vpop.xlane.xlu0 %167 }
  0xf1   :  { %v531_v39 = vpack.c.bf16 %v508_v27, %v507_v50  ;;  %v354_v61 = vmul.f32 %v735_v9, %v1208_v42  ;;  %v1320_v2 = vpop.eup %736  ;;  %v246_v63 = vand.u32 2147483648, %v1246_v4  ;;  %v493_v7 = vmul.f32 %v1227_v18, %v949_v12  ;;  %v1328_v50 = vpop.xlane.xlu1 %133 }
  0xf2   :  { %v523_v15 = vpack.c.bf16 %v492_v23, %v491_v62  ;;  %v739_v1 = vpop.eup %738  ;;  %v494_v0 = vmul.f32 %v1232_v58, %v951_v13  ;;  %756 = vrsqrt.f32 %v1316_v43  ;;  %vm245_vm13 = vcmp.eq.f32.partialorder %v1246_v4, 0.0 }
  0xf3   :  { %647 = vmatprep.subr.bf16.mxu0 %v531_v39  ;;  %v741_v47 = vpop.eup %740  ;;  %v356_v14 = vsel %vm355_vm8, %v1208_v42, %v354_v61  ;;  %v361_v26 = vmul.f32 %v739_v1, %v1225_v3  ;;  %758 = vrcp.f32 %v420_v59  ;;  %vm250_vm14 = vcmp.eq.f32.partialorder %v1266_v30, inf }
  0xf4   :  { %648 = vmatpush3.bf16.xpose.msra.mxu0 %v523_v15  ;;  %v743_v35 = vpop.eup %742  ;;  %v511_v12 = vmul.f32 %v1252_v19, %v957_v16  ;;  %v512_v18 = vmul.f32 %v1258_v46, %v959_v17  ;;  %vm252_vm15 = vcmp.eq.f32.partialorder %v1266_v30, 0.0  ;;  %v253_v58 = vand.u32 2147483648, %v1266_v30 }
  0xf5   :  { %649 = vmatprep.subr.bf16.mxu0 %v532_v11  ;;  %v1343_v6 = vpop.eup %744  ;;  %v363_v13 = vsel %vm362_vm10, %v1225_v3, %v361_v26  ;;  %760 = vrsqrt.f32 %v1328_v50  ;;  %v359_v16 = vsel %vm357_vm9, %v358_v8, %v356_v14  ;;  %v242_v17 = vmul.f32 %v741_v47, %v1246_v4  ;;  %v1367_v34 = vpop.xlane.xlu1 %169 }
  0xf6   :  { %v747_v59 = vpop.eup %746  ;;  %762 = vrcp.f32 %v403_v38  ;;  %vm369_vm0 = vcmp.eq.f32.partialorder %v1282_v54, inf  ;;  %v366_v46 = vsel %vm364_vm11, %v365_v31, %v363_v13  ;;  %v524_v9 = vpack.c.bf16 %v494_v0, %v493_v7 }
  0xf7   :  { %v1357_v19 = vpop.eup %748  ;;  %764 = vrcp.f32 %v404_v5  ;;  %v249_v27 = vmul.f32 %v747_v59, %v1266_v30  ;;  %vm371_vm1 = vcmp.eq.f32.partialorder %v1282_v54, 0.0  ;;  %v372_v42 = vand.u32 2147483648, %v1282_v54  ;;  %v1385_v5 = vpop.xlane.xlu0 %135 }
  0xf8   :  { %v1362_v10 = vpop.eup %750  ;;  %v533_v8 = vpack.c.bf16 %v512_v18, %v511_v12  ;;  %766 = vrsqrt.f32 %v1351_v51  ;;  %v421_v62 = vmax.f32 %v359_v16, 1e-12  ;;  %vm376_vm2 = vcmp.eq.f32.partialorder %v1303_v22, inf }
  0xf9   :  { %vm378_vm3 = vcmp.eq.f32.partialorder %v1303_v22, 0.0  ;;  %v379_v3 = vand.u32 2147483648, %v1303_v22  ;;  %v753_v23 = vpop.eup %752  ;;  %v422_v39 = vmax.f32 %v366_v46, 1e-12  ;;  %v244_v61 = vsel %vm243_vm12, %v1246_v4, %v242_v17 }
  0xfa   :  { %vm257_vm4 = vcmp.eq.f32.partialorder %v1316_v43, inf  ;;  %v495_v11 = vmul.f32 %v1277_v60, %v965_v20  ;;  %v755_v15 = vpop.eup %754  ;;  %v251_v31 = vsel %vm250_vm14, %v1266_v30, %v249_v27  ;;  %v368_v1 = vmul.f32 %v753_v23, %v1282_v54 }
  0xfb   :  { %v496_v38 = vmul.f32 %v1287_v55, %v967_v21  ;;  %768 = vrsqrt.f32 %v1367_v34  ;;  %v375_v7 = vmul.f32 %v755_v15, %v1303_v22  ;;  %vm259_vm5 = vcmp.eq.f32.partialorder %v1316_v43, 0.0 }
  0xfc   :  { %650 = vmatpush3.bf16.xpose.msra.mxu0 %v524_v9  ;;  %v260_v20 = vand.u32 2147483648, %v1316_v43  ;;  %v513_v60 = vmul.f32 %v1320_v2, %v973_v24  ;;  %v757_v47 = vpop.eup %756  ;;  %770 = vrcp.f32 %v421_v62  ;;  %v247_v14 = vsel %vm245_vm13, %v246_v63, %v244_v61 }
  0xfd   :  { %651 = vmatprep.subr.bf16.mxu0 %v533_v8  ;;  %v370_v21 = vsel %vm369_vm0, %v1282_v54, %v368_v1  ;;  %v514_v55 = vmul.f32 %v743_v35, %v975_v25  ;;  %v759_v26 = vpop.eup %758  ;;  %v254_v0 = vsel %vm252_vm15, %v253_v58, %v251_v31  ;;  %v377_v12 = vsel %vm376_vm2, %v1303_v22, %v375_v7  ;;  %v1411_v58 = vpop.xlane.xlu1 %137 }
  0xfe   :  { %v256_v24 = vmul.f32 %v757_v47, %v1316_v43  ;;  %772 = vrsqrt.f32 %v1385_v5  ;;  %v373_v2 = vsel %vm371_vm1, %v372_v42, %v370_v21  ;;  %v380_v25 = vsel %vm378_vm3, %v379_v3, %v377_v12 }
  0xff   :  { %v761_v4 = vpop.eup %760  ;;  %774 = vrcp.f32 %v422_v39  ;;  %v525_v63 = vpack.c.bf16 %v496_v38, %v495_v11  ;;  %v405_v30 = vmax.f32 %v247_v14, 1e-12  ;;  %vm264_vm6 = vcmp.eq.f32.partialorder %v1328_v50, inf }
 0x100   :  { %v763_v35 = vpop.eup %762  ;;  %v263_v18 = vmul.f32 %v761_v4, %v1328_v50  ;;  %v534_v13 = vpack.c.bf16 %v514_v55, %v513_v60  ;;  %v406_v16 = vmax.f32 %v254_v0, 1e-12  ;;  %vm266_vm7 = vcmp.eq.f32.partialorder %v1328_v50, 0.0 }
 0x101   :  { %v765_v59 = vpop.eup %764  ;;  %v267_v54 = vand.u32 2147483648, %v1328_v50  ;;  %vm383_vm8 = vcmp.eq.f32.partialorder %v1351_v51, inf  ;;  %v423_v17 = vmax.f32 %v373_v2, 1e-12  ;;  %v424_v46 = vmax.f32 %v380_v25, 1e-12 }
 0x102   :  { %v767_v22 = vpop.eup %766  ;;  %v258_v27 = vsel %vm257_vm4, %v1316_v43, %v256_v24  ;;  %vm385_vm9 = vcmp.eq.f32.partialorder %v1351_v51, 0.0  ;;  %v265_v9 = vsel %vm264_vm6, %v1328_v50, %v263_v18  ;;  %776 = vrsqrt.f32 %v1411_v58 }
 0x103   :  { %v382_v42 = vmul.f32 %v767_v22, %v1351_v51  ;;  %v497_v8 = vmul.f32 %v1343_v6, %v981_v28  ;;  %778 = vrcp.f32 %v405_v30  ;;  %v386_v62 = vand.u32 2147483648, %v1351_v51 }
 0x104   :  { %652 = vmatpush3.bf16.xpose.msra.mxu0 %v525_v63  ;;  %v498_v3 = vmul.f32 %v1357_v19, %v983_v29  ;;  %v515_v23 = vmul.f32 %v1362_v10, %v989_v32  ;;  %780 = vrcp.f32 %v406_v16  ;;  %v261_v61 = vsel %vm259_vm5, %v260_v20, %v258_v27 }
 0x105   :  { %653 = vmatprep.subr.bf16.mxu0 %v534_v13  ;;  %v769_v39 = vpop.eup %768  ;;  %v384_v11 = vsel %vm383_vm8, %v1351_v51, %v382_v42  ;;  %v516_v28 = vmul.f32 %v759_v26, %v991_v33  ;;  %782 = vrcp.f32 %v423_v17  ;;  %v268_v6 = vsel %vm266_vm7, %v267_v54, %v265_v9 }
 0x106   :  { %v389_v29 = vmul.f32 %v769_v39, %v1367_v34  ;;  %vm390_vm10 = vcmp.eq.f32.partialorder %v1367_v34, inf  ;;  %v771_v32 = vpop.eup %770  ;;  %784 = vrcp.f32 %v424_v46  ;;  %v387_v43 = vsel %vm385_vm9, %v386_v62, %v384_v11  ;;  %v1494_v39 = vld [vmem:[#allocation13_spill] sm:$0xff] }
 0x107   :  { %v393_v19 = vand.u32 2147483648, %v1367_v34  ;;  %v526_v10 = vpack.c.bf16 %v498_v3, %v497_v8  ;;  %v407_v31 = vmax.f32 %v261_v61, 1e-12  ;;  %vm392_vm11 = vcmp.eq.f32.partialorder %v1367_v34, 0.0  ;;  %v1493_v3 = vld [vmem:[#allocation12_spill] sm:$0xff] }
 0x108   :  { %v773_v15 = vpop.eup %772  ;;  %v391_v33 = vsel %vm390_vm10, %v1367_v34, %v389_v29  ;;  %v535_v50 = vpack.c.bf16 %v516_v28, %v515_v23  ;;  %v408_v38 = vmax.f32 %v268_v6, 1e-12  ;;  %v425_v60 = vmax.f32 %v387_v43, 1e-12 }
 0x109   :  { %v775_v1 = vpop.eup %774  ;;  %v394_v7 = vsel %vm392_vm11, %v393_v19, %v391_v33  ;;  %v270_v20 = vmul.f32 %v773_v15, %v1385_v5  ;;  %vm271_vm12 = vcmp.eq.f32.partialorder %v1385_v5, inf  ;;  %v499_v14 = vmul.f32 %v763_v35, %v997_v36 }
 0x10a   :  { %v426_v51 = vmax.f32 %v394_v7, 1e-12  ;;  %v500_v21 = vmul.f32 %v765_v59, %v999_v37  ;;  %786 = vrcp.f32 %v407_v31  ;;  %v274_v34 = vand.u32 2147483648, %v1385_v5 }
 0x10b   :  { %v272_v47 = vsel %vm271_vm12, %v1385_v5, %v270_v20  ;;  %v517_v55 = vmul.f32 %v771_v32, %v1005_v40  ;;  %v518_v26 = vmul.f32 %v775_v1, %v1007_v41  ;;  %788 = vrcp.f32 %v408_v38 }
 0x10c   :  { %654 = vmatpush3.bf16.xpose.msra.mxu0 %v526_v10  ;;  %v777_v0 = vpop.eup %776  ;;  %vm273_vm13 = vcmp.eq.f32.partialorder %v1385_v5, 0.0  ;;  %790 = vrcp.f32 %v425_v60  ;;  %vm278_vm14 = vcmp.eq.f32.partialorder %v1411_v58, inf  ;;  %v281_v37 = vand.u32 2147483648, %v1411_v58 }
 0x10d   :  { %655 = vmatprep.subr.bf16.mxu0 %v535_v50  ;;  %v779_v12 = vpop.eup %778  ;;  %v275_v24 = vsel %vm273_vm13, %v274_v34, %v272_v47  ;;  %v277_v4 = vmul.f32 %v777_v0, %v1411_v58  ;;  %792 = vrcp.f32 %v426_v51  ;;  %v527_v2 = vpack.c.bf16 %v500_v21, %v499_v14 }
 0x10e   :  { %v781_v36 = vpop.eup %780  ;;  %vm280_vm15 = vcmp.eq.f32.partialorder %v1411_v58, 0.0  ;;  %v536_v41 = vpack.c.bf16 %v518_v26, %v517_v55  ;;  %v409_v5 = vmax.f32 %v275_v24, 1e-12  ;;  %v501_v18 = vmul.f32 %v779_v12, %v1013_v44 }
 0x10f   :  { %v783_v25 = vpop.eup %782  ;;  %v279_v40 = vsel %vm278_vm14, %v1411_v58, %v277_v4  ;;  %v502_v13 = vmul.f32 %v781_v36, %v1015_v45 }
 0x110   :  { %v785_v63 = vpop.eup %784  ;;  %v282_v35 = vsel %vm280_vm15, %v281_v37, %v279_v40  ;;  %v519_v59 = vmul.f32 %v783_v25, %v1021_v48  ;;  %794 = vrcp.f32 %v409_v5 }
 0x111   :  { %v410_v30 = vmax.f32 %v282_v35, 1e-12  ;;  %v520_v16 = vmul.f32 %v785_v63, %v1023_v49  ;;  %v528_v58 = vpack.c.bf16 %v502_v13, %v501_v18 }
 0x113   :  { %796 = vrcp.f32 %v410_v30  ;;  %v537_v46 = vpack.c.bf16 %v520_v16, %v519_v59 }
 0x114   :  { %656 = vmatpush3.bf16.xpose.msra.mxu0 %v527_v2  ;;  %v787_v54 = vpop.eup %786 }
 0x115   :  { %657 = vmatprep.subr.bf16.mxu0 %v536_v41  ;;  %v789_v22 = vpop.eup %788  ;;  %v503_v9 = vmul.f32 %v787_v54, %v1029_v52  ;;  %v1495_v52 = vld [vmem:[#allocation14_spill] sm:$0xff] }
 0x116   :  { %v791_v17 = vpop.eup %790  ;;  %v504_v44 = vmul.f32 %v789_v22, %v1031_v53  ;;  %v558_v53 = vpop.xlane.xlu0 %557 }
 0x117   :  { %v793_v27 = vpop.eup %792  ;;  %v521_v45 = vmul.f32 %v791_v17, %v1037_v56  ;;  %798 = vrsqrt.f32 %v558_v53  ;;  %vm561_vm0 = vcmp.eq.f32.partialorder %v558_v53, inf  ;;  %vm563_vm1 = vcmp.eq.f32.partialorder %v558_v53, 0.0 }
 0x118   :  { %v522_v48 = vmul.f32 %v793_v27, %v1039_v57  ;;  %v529_v49 = vpack.c.bf16 %v504_v44, %v503_v9  ;;  %v564_v57 = vand.u32 2147483648, %v558_v53 }
 0x11a   :  { %v795_v42 = vpop.eup %794  ;;  %v538_v62 = vpack.c.bf16 %v522_v48, %v521_v45 }
 0x11b   :  { %v505_v23 = vmul.f32 %v795_v42, %v1493_v3 }
 0x11c   :  { %658 = vmatpush3.bf16.xpose.msra.mxu0 %v528_v58 }
 0x11d   :  { %659 = vmatprep.subr.bf16.mxu0 %v537_v46  ;;  %v797_v8 = vpop.eup %796 }
 0x11e   :  { %v506_v61 = vmul.f32 %v797_v8, %v1494_v39 }
 0x120   :  { %v530_v11 = vpack.c.bf16 %v506_v61, %v505_v23 }
 0x121   :  { %v799_v28 = vpop.eup %798 }
 0x122   :  { %v560_v56 = vmul.f32 %v799_v28, %v558_v53 }
 0x124   :  { %660 = vmatpush3.bf16.xpose.msra.mxu0 %v529_v49  ;;  %v562_v6 = vsel %vm561_vm0, %v558_v53, %v560_v56 }
 0x125   :  { %661 = vmatprep.subr.bf16.mxu0 %v538_v62  ;;  %v565_v29 = vsel %vm563_vm1, %v564_v57, %v562_v6 }
 0x126   :  { %v566_v32 = vmax.f32 %v565_v29, 1e-12 }
 0x128   :  { %800 = vrcp.f32 %v566_v32 }
 0x12c   :  { %662 = vmatpush3.bf16.xpose.msra.mxu0 %v530_v11 }
 0x132   :  { %v801_v43 = vpop.eup %800 }
 0x133   :  { %664 = vmatmul.mubr.bf16.vlgmr.msra.gmra.mrb[0].mxu0 %v1495_v52 }
 0x206   :  { %v620_v19 = vpop.f32.mrb[0].mxu0 }
 0x207   :  { %v627_v10 = vmul.f32 %v801_v43, %v620_v19  ;;  %v622_v15 = vpop.f32.mrb[1].mxu0 }
 0x208   :  { %v628_v31 = vmul.f32 %v801_v43, %v622_v15  ;;  %v624_v33 = vpop.f32.mrb[2].mxu0 }
 0x209   :  { %629 = vst [vmem:[#allocation8] sm:$0xff] %v627_v10  ;;  %v625_v50 = vpop.f32.mrb[3].mxu0 }
 0x20a   :  { %630 = vst [vmem:[#allocation8 + $0x8] sm:$0xff] %v628_v31 }
 0x20b   :  { %857 = shalt.err (!%p854_p6)
}
 0x20c   :  { %s858_s10 = scalar_lea.hbm %s1484_s2, 256 }
 0x20d   :  { %p859_p7 = scmp.ne.s32.totalorder %s1484_s2, %s858_s10  ;;  %p862_p8 = scmp.lt.u32.totalorder %s858_s10, %s1484_s2 }
 0x20f   :  { %p864_p9 = pnand %p862_p8, %p859_p7 }
 0x211   :  { %867 = shalt.err (!%p864_p9)
}
 0x212   :  { %640 = dma.vmem_to_hbm [thread:$0]  %s638_s6, 256, %s1484_s2, [#allocation5]  }
 0x213   :  { %872 = dma.done.wait [#allocation5], 256  }
 0x214   :  { %873 = vsyncadd [#allocation5], 4294967040 }
 0x215   :  { %644 = vsyncpa [#allocation4], 1 }
 0x216   :  { %645 = vsyncpa [#allocation7], 1 }
 0x217   :  { %646 = vsyncpa [#allocation5], 1 }

</bundles_post_ra>
